<compile_context>
chip_gen: v6e
topology: v6e:2x2x1
jax: 0.10.0
libtpu: 0.0.40
codegen_flags: <defaults>
</compile_context>

<pallas_src>
import jax
import jax.numpy as jnp
from jax.experimental import pallas as pl
from jax.experimental.pallas import tpu as pltpu


def ppo_actor_kernel(x_ref, w1_ref, b1_ref, w2_ref, b2_ref, w3_ref, b3_ref, o_ref):
    # Layer 1: Linear + Tanh  (MXU matmul, VPU bias add, EUP tanh — separate VLIW slots)
    h1 = jnp.tanh(
        jnp.dot(x_ref[...], w1_ref[...], preferred_element_type=jnp.float32)
        + b1_ref[...]
    )
    # Layer 2: Linear + Tanh
    h2 = jnp.tanh(
        jnp.dot(h1, w2_ref[...], preferred_element_type=jnp.float32) + b2_ref[...]
    )
    # Layer 3: Linear, then forward()'s final tanh
    o_ref[...] = jnp.tanh(
        jnp.dot(h2, w3_ref[...], preferred_element_type=jnp.float32) + b3_ref[...]
    )


def ppo_actor_forward(states, params, *, tb=2048):
    """states: [B, D] float32.  params: dict of w1,b1,w2,b2,w3,b3 (w: [in, out], b: [1, out])."""
    B, D = states.shape
    H = params["w1"].shape[1]
    A = params["w3"].shape[1]

    # Large batch tile; clamp to B so tiny batches run as a single grid step.
    # tb=2048 is divisible by 8 (sublane constraint); when tb == B the block is the
    # full array extent so the (8,128) rule is satisfied either way.
    tb = min(B, tb)
    grid = (pl.cdiv(B, tb),)

    # Advisory cost model so the surrounding XLA program can overlap this kernel.
    cost = pl.CostEstimate(
        flops=2 * B * (D * H + H * H + H * A),
        transcendentals=B * (2 * H + A),
        bytes_accessed=4 * (B * D + B * A + D * H + H * H + H * A + 2 * H + A),
    )

    in_specs = [
        pl.BlockSpec((tb, D), lambda i: (i, 0)),   # states tile (only operand that streams)
        # Weights/biases: constant block index -> stay resident in VMEM across grid steps.
        pl.BlockSpec((D, H), lambda i: (0, 0)),    # w1
        pl.BlockSpec((1, H), lambda i: (0, 0)),    # b1
        pl.BlockSpec((H, H), lambda i: (0, 0)),    # w2
        pl.BlockSpec((1, H), lambda i: (0, 0)),    # b2
        pl.BlockSpec((H, A), lambda i: (0, 0)),    # w3
        pl.BlockSpec((1, A), lambda i: (0, 0)),    # b3
    ]
    out_specs = pl.BlockSpec((tb, A), lambda i: (i, 0))

    return pl.pallas_call(
        ppo_actor_kernel,
        out_shape=jax.ShapeDtypeStruct((B, A), jnp.float32),
        grid_spec=pl.GridSpec(grid=grid, in_specs=in_specs, out_specs=out_specs),
        compiler_params=pltpu.CompilerParams(
            dimension_semantics=("parallel",)  # lets v7x shard the batch axis across its 2 TCs
        ),
        cost_estimate=cost,
    )(
        states,
        params["w1"], params["b1"],
        params["w2"], params["b2"],
        params["w3"], params["b3"],
    )


def init_params(key, state_dim, hidden, action_dim):
    """Deterministic synthetic init (PyTorch-Linear-like uniform bounds)."""
    k1, k2, k3, k4, k5, k6 = jax.random.split(key, 6)

    def lin(kw, kb, fan_in, fan_out):
        bound = 1.0 / jnp.sqrt(fan_in)
        w = jax.random.uniform(kw, (fan_in, fan_out), jnp.float32, -bound, bound)
        b = jax.random.uniform(kb, (1, fan_out), jnp.float32, -bound, bound)
        return w, b

    w1, b1 = lin(k1, k2, state_dim, hidden)
    w2, b2 = lin(k3, k4, hidden, hidden)
    w3, b3 = lin(k5, k6, hidden, action_dim)
    return {"w1": w1, "b1": b1, "w2": w2, "b2": b2, "w3": w3, "b3": b3}


def reference_forward(states, p):
    h1 = jnp.tanh(states @ p["w1"] + p["b1"])
    h2 = jnp.tanh(h1 @ p["w2"] + p["b2"])
    return jnp.tanh(h2 @ p["w3"] + p["b3"])


if __name__ == "__main__":
    key = jax.random.PRNGKey(0)
    k_params, k_states = jax.random.split(key)

    B, STATE_DIM, HIDDEN, ACTION_DIM = 256, 16, 64, 4

    params = init_params(k_params, STATE_DIM, HIDDEN, ACTION_DIM)
    states = jax.random.normal(k_states, (B, STATE_DIM), dtype=jnp.float32)
    ref = reference_forward(states, params)

    # Default (large-tile) path: tb clamps to B -> single grid step.
    out = ppo_actor_forward(states, params)
    out = jax.block_until_ready(out)
    assert out.shape == (B, ACTION_DIM)
    assert jnp.allclose(out, ref, atol=1e-5, rtol=1e-5), "mismatch vs JAX reference (tb=B)"

    # Multi-step path: exercise the batch-tiled pipeline (4 grid steps).
    out_tiled = ppo_actor_forward(states, params, tb=64)
    out_tiled = jax.block_until_ready(out_tiled)
    assert jnp.allclose(out_tiled, ref, atol=1e-5, rtol=1e-5), "mismatch vs JAX reference (tb=64)"

    print("KERNEL_OK")
</pallas_src>

<mosaic_0001>
module attributes {stable_mosaic.version = 11 : i64} {
  func.func @ppo_actor_kernel(%arg0: i32, %arg1: memref<256x16xf32, #tpu.memory_space<vmem>>, %arg2: memref<16x64xf32, #tpu.memory_space<vmem>>, %arg3: memref<1x64xf32, #tpu.memory_space<vmem>>, %arg4: memref<64x64xf32, #tpu.memory_space<vmem>>, %arg5: memref<1x64xf32, #tpu.memory_space<vmem>>, %arg6: memref<64x4xf32, #tpu.memory_space<vmem>>, %arg7: memref<1x4xf32, #tpu.memory_space<vmem>>, %arg8: memref<256x4xf32, #tpu.memory_space<vmem>>) attributes {dimension_semantics = [#tpu.dimension_semantics<parallel>], iteration_bounds = array<i64: 1>, scalar_prefetch = 0 : i64, scratch_operands = 0 : i64, tpu.core_type = #tpu.core_type<tc>, window_params = [{transform_indices = @transform_0, window_bounds = array<i64: 256, 16>}, {pipeline_mode = #tpu.pipeline_mode<synchronous>, transform_indices = @transform_1, window_bounds = array<i64: 16, 64>}, {pipeline_mode = #tpu.pipeline_mode<synchronous>, transform_indices = @transform_2, window_bounds = array<i64: 1, 64>}, {pipeline_mode = #tpu.pipeline_mode<synchronous>, transform_indices = @transform_3, window_bounds = array<i64: 64, 64>}, {pipeline_mode = #tpu.pipeline_mode<synchronous>, transform_indices = @transform_4, window_bounds = array<i64: 1, 64>}, {pipeline_mode = #tpu.pipeline_mode<synchronous>, transform_indices = @transform_5, window_bounds = array<i64: 64, 4>}, {pipeline_mode = #tpu.pipeline_mode<synchronous>, transform_indices = @transform_6, window_bounds = array<i64: 1, 4>}, {transform_indices = @transform_7, window_bounds = array<i64: 256, 4>}]} {
    %c0 = arith.constant 0 : index
    %c0_0 = arith.constant 0 : index
    %0 = vector.load %arg1[%c0, %c0_0] : memref<256x16xf32, #tpu.memory_space<vmem>>, vector<256x16xf32>
    %c0_1 = arith.constant 0 : index
    %c0_2 = arith.constant 0 : index
    %1 = vector.load %arg2[%c0_1, %c0_2] : memref<16x64xf32, #tpu.memory_space<vmem>>, vector<16x64xf32>
    %cst = arith.constant dense<0.000000e+00> : vector<256x64xf32>
    %2 = tpu.matmul %0, %1, %cst {dimension_numbers = #tpu.dot_dimension_numbers<[1], [0], [0], [1], [0, 0, 1, 1], [], []>} : vector<256x16xf32>, vector<16x64xf32>, vector<256x64xf32> -> vector<256x64xf32>
    %c0_3 = arith.constant 0 : index
    %c0_4 = arith.constant 0 : index
    %3 = vector.load %arg3[%c0_3, %c0_4] : memref<1x64xf32, #tpu.memory_space<vmem>>, vector<1x64xf32>
    %4 = vector.broadcast %3 : vector<1x64xf32> to vector<256x64xf32>
    %5 = arith.addf %2, %4 : vector<256x64xf32>
    %6 = math.tanh %5 : vector<256x64xf32>
    %c0_5 = arith.constant 0 : index
    %c0_6 = arith.constant 0 : index
    %7 = vector.load %arg4[%c0_5, %c0_6] : memref<64x64xf32, #tpu.memory_space<vmem>>, vector<64x64xf32>
    %cst_7 = arith.constant dense<0.000000e+00> : vector<256x64xf32>
    %8 = tpu.matmul %6, %7, %cst_7 {dimension_numbers = #tpu.dot_dimension_numbers<[1], [0], [0], [1], [0, 0, 1, 1], [], []>} : vector<256x64xf32>, vector<64x64xf32>, vector<256x64xf32> -> vector<256x64xf32>
    %c0_8 = arith.constant 0 : index
    %c0_9 = arith.constant 0 : index
    %9 = vector.load %arg5[%c0_8, %c0_9] : memref<1x64xf32, #tpu.memory_space<vmem>>, vector<1x64xf32>
    %10 = vector.broadcast %9 : vector<1x64xf32> to vector<256x64xf32>
    %11 = arith.addf %8, %10 : vector<256x64xf32>
    %12 = math.tanh %11 : vector<256x64xf32>
    %c0_10 = arith.constant 0 : index
    %c0_11 = arith.constant 0 : index
    %13 = vector.load %arg6[%c0_10, %c0_11] : memref<64x4xf32, #tpu.memory_space<vmem>>, vector<64x4xf32>
    %cst_12 = arith.constant dense<0.000000e+00> : vector<256x4xf32>
    %14 = tpu.matmul %12, %13, %cst_12 {dimension_numbers = #tpu.dot_dimension_numbers<[1], [0], [0], [1], [0, 0, 1, 1], [], []>} : vector<256x64xf32>, vector<64x4xf32>, vector<256x4xf32> -> vector<256x4xf32>
    %c0_13 = arith.constant 0 : index
    %c0_14 = arith.constant 0 : index
    %15 = vector.load %arg7[%c0_13, %c0_14] : memref<1x4xf32, #tpu.memory_space<vmem>>, vector<1x4xf32>
    %16 = vector.broadcast %15 : vector<1x4xf32> to vector<256x4xf32>
    %17 = arith.addf %14, %16 : vector<256x4xf32>
    %18 = math.tanh %17 : vector<256x4xf32>
    %c0_15 = arith.constant 0 : index
    %c0_16 = arith.constant 0 : index
    %19 = vector.load %arg8[%c0_15, %c0_16] : memref<256x4xf32, #tpu.memory_space<vmem>>, vector<256x4xf32>
    tpu.vector_store %arg8[%c0_15, %c0_16], %18 {strides = array<i32>} : memref<256x4xf32, #tpu.memory_space<vmem>>, vector<256x4xf32>,
    return
  }
  func.func @transform_0(%arg0: i32) -> (i32, i32) {
    %c0_i32 = arith.constant 0 : i32
    %c0_i32_0 = arith.constant 0 : i32
    return %arg0, %c0_i32 : i32, i32
  }
  func.func @transform_1(%arg0: i32) -> (i32, i32) {
    %c0_i32 = arith.constant 0 : i32
    %c0_i32_0 = arith.constant 0 : i32
    %c0_i32_1 = arith.constant 0 : i32
    return %c0_i32, %c0_i32_0 : i32, i32
  }
  func.func @transform_2(%arg0: i32) -> (i32, i32) {
    %c0_i32 = arith.constant 0 : i32
    %c0_i32_0 = arith.constant 0 : i32
    %c0_i32_1 = arith.constant 0 : i32
    return %c0_i32, %c0_i32_0 : i32, i32
  }
  func.func @transform_3(%arg0: i32) -> (i32, i32) {
    %c0_i32 = arith.constant 0 : i32
    %c0_i32_0 = arith.constant 0 : i32
    %c0_i32_1 = arith.constant 0 : i32
    return %c0_i32, %c0_i32_0 : i32, i32
  }
  func.func @transform_4(%arg0: i32) -> (i32, i32) {
    %c0_i32 = arith.constant 0 : i32
    %c0_i32_0 = arith.constant 0 : i32
    %c0_i32_1 = arith.constant 0 : i32
    return %c0_i32, %c0_i32_0 : i32, i32
  }
  func.func @transform_5(%arg0: i32) -> (i32, i32) {
    %c0_i32 = arith.constant 0 : i32
    %c0_i32_0 = arith.constant 0 : i32
    %c0_i32_1 = arith.constant 0 : i32
    return %c0_i32, %c0_i32_0 : i32, i32
  }
  func.func @transform_6(%arg0: i32) -> (i32, i32) {
    %c0_i32 = arith.constant 0 : i32
    %c0_i32_0 = arith.constant 0 : i32
    %c0_i32_1 = arith.constant 0 : i32
    return %c0_i32, %c0_i32_0 : i32, i32
  }
  func.func @transform_7(%arg0: i32) -> (i32, i32) {
    %c0_i32 = arith.constant 0 : i32
    %c0_i32_0 = arith.constant 0 : i32
    return %arg0, %c0_i32 : i32, i32
  }
}

</mosaic_0001>

<bundles_post_ra>
// kernel: tpu_custom_call.1
= control target key start
LH: loop header
LB: loop body
LE: loop exit
PB: predicated region body
PF: predicated region fallthrough
CT: control target
= control target key end

     0   :  { %vm67_vm0 = vcmask 130048   ;;  %vm436_vm1 = vcmask 523264   ;;  %vm1158_vm2 = vcmask 31744   ;;  %s2321_s1 = inlined_call_operand.vmem [shape: f32[16,64], index: 1, kind: input, shape index: {}]   ;;  %s2322_s0 = inlined_call_operand.vmem [shape: f32[256,16], index: 0, kind: input, shape index: {}]   ;;  %s2323_s3 = inlined_call_operand.vmem [shape: f32[64,64], index: 3, kind: input, shape index: {}]   ;;  %s2324_s5 = inlined_call_operand.vmem [shape: f32[64,4], index: 5, kind: input, shape index: {}]   ;;  %s2325_s2 = inlined_call_operand.vmem [shape: f32[1,64], index: 2, kind: input, shape index: {}]   ;;  %s2326_s4 = inlined_call_operand.vmem [shape: f32[1,64], index: 4, kind: input, shape index: {}]   ;;  %s2327_s6 = inlined_call_operand.vmem [shape: f32[1,4], index: 6, kind: input, shape index: {}]   ;;  %s2328_s7 = inlined_call_operand.vmem [shape: f32[256,4], index: 7, kind: output, shape index: {}]  }
   0x1   :  { %v59_v0 = vld [vmem:[%s2321_s1 + $0x8] sm:$0xff]  ;;  %v58_v1 = vld [vmem:[%s2321_s1] sm:$0xff]  ;;  %v28_v4 = vld [vmem:[%s2322_s0 + $0x10] sm:$0xff] }
   0x2   :  { %v26_v2 = vld [vmem:[%s2322_s0] sm:$0xff]  ;;  %1408 = vmatprep.subr.mxu0 %v59_v0  ;;  %v27_v3 = vld [vmem:[%s2322_s0 + $0x8] sm:$0xff]  ;;  %1588 = vmatprep.subr.mxu1 %v59_v0  ;;  %v29_v5 = vld [vmem:[%s2322_s0 + $0x18] sm:$0xff] }
   0x3   :  { %1412 = vmatprep.mubr.msk.f32.mxu0 %vm67_vm0, %v26_v2  ;;  %1409 = vmatpush3.msra.mxu0 %v59_v0  ;;  %v42_v6 = vld [vmem:[%s2322_s0 + $0x80] sm:$0xff]  ;;  %v43_v7 = vld [vmem:[%s2322_s0 + $0x88] sm:$0xff]  ;;  %v44_v8 = vld [vmem:[%s2322_s0 + $0x90] sm:$0xff] }
   0x4   :  { %1410 = vmatprep.subr.mxu0 %v58_v1  ;;  %1590 = vmatpush3.msra.mxu1 %v59_v0  ;;  %v30_v9 = vld [vmem:[%s2322_s0 + $0x20] sm:$0xff]  ;;  %v45_v10 = vld [vmem:[%s2322_s0 + $0x98] sm:$0xff]  ;;  %v31_v11 = vld [vmem:[%s2322_s0 + $0x28] sm:$0xff] }
   0x5   :  { %1411 = vmatpush3.msra.mxu0 %v58_v1  ;;  %1589 = vmatprep.subr.mxu1 %v58_v1  ;;  %v46_v12 = vld [vmem:[%s2322_s0 + $0xa0] sm:$0xff]  ;;  %v32_v13 = vld [vmem:[%s2322_s0 + $0x30] sm:$0xff]  ;;  %v428_v14 = vld [vmem:[%s2323_s3 + $0x38] sm:$0xff] }
   0x6   :  { %1413 = vmatmul.mubr.msk.f32.vlgmr.msra.gmra.mxu0 %vm67_vm0, %v27_v3  ;;  %1591 = vmatpush3.msra.mxu1 %v58_v1  ;;  %v427_v15 = vld [vmem:[%s2323_s3 + $0x30] sm:$0xff]  ;;  %v47_v16 = vld [vmem:[%s2322_s0 + $0xa8] sm:$0xff]  ;;  %v33_v17 = vld [vmem:[%s2322_s0 + $0x38] sm:$0xff] }
   0x7   :  { %1415 = vmatprep.mubr.msk.f32.mxu0 %vm67_vm0, %v28_v4  ;;  %1436 = vmatprep.mubr.msk.f32.mxu1 %vm67_vm0, %v42_v6  ;;  %v48_v18 = vld [vmem:[%s2322_s0 + $0xb0] sm:$0xff]  ;;  %v34_v19 = vld [vmem:[%s2322_s0 + $0x40] sm:$0xff]  ;;  %v426_v20 = vld [vmem:[%s2323_s3 + $0x28] sm:$0xff] }
   0x8   :  { %1437 = vmatmul.mubr.msk.f32.vlgmr.msra.gmra.mxu1 %vm67_vm0, %v43_v7  ;;  %1460 = vmatprep.subr.mxu1 %v428_v14  ;;  %v49_v21 = vld [vmem:[%s2322_s0 + $0xb8] sm:$0xff]  ;;  %v35_v22 = vld [vmem:[%s2322_s0 + $0x48] sm:$0xff]  ;;  %v50_v23 = vld [vmem:[%s2322_s0 + $0xc0] sm:$0xff] }
   0x9   :  { %1439 = vmatprep.mubr.msk.f32.mxu1 %vm67_vm0, %v44_v8  ;;  %1461 = vmatpush3.msra.mxu1 %v428_v14  ;;  %v36_v24 = vld [vmem:[%s2322_s0 + $0x50] sm:$0xff]  ;;  %v425_v25 = vld [vmem:[%s2323_s3 + $0x20] sm:$0xff]  ;;  %v51_v26 = vld [vmem:[%s2322_s0 + $0xc8] sm:$0xff] }
   0xa   :  { %1416 = vmatmul.mubr.msk.f32.gmra.mxu0 %vm67_vm0, %v29_v5  ;;  %1462 = vmatprep.subr.mxu1 %v427_v15  ;;  %v37_v27 = vld [vmem:[%s2322_s0 + $0x58] sm:$0xff]  ;;  %v52_v28 = vld [vmem:[%s2322_s0 + $0xd0] sm:$0xff]  ;;  %v38_v29 = vld [vmem:[%s2322_s0 + $0x60] sm:$0xff] }
   0xb   :  { %1418 = vmatprep.mubr.msk.f32.mxu0 %vm67_vm0, %v30_v9  ;;  %1463 = vmatpush3.msra.mxu1 %v427_v15  ;;  %v53_v30 = vld [vmem:[%s2322_s0 + $0xd8] sm:$0xff]  ;;  %v39_v31 = vld [vmem:[%s2322_s0 + $0x68] sm:$0xff]  ;;  %v54_v32 = vld [vmem:[%s2322_s0 + $0xe0] sm:$0xff] }
   0xc   :  { %1440 = vmatmul.mubr.msk.f32.gmra.mxu1 %vm67_vm0, %v45_v10  ;;  %1464 = vmatprep.subr.mxu1 %v426_v20  ;;  %v40_v33 = vld [vmem:[%s2322_s0 + $0x70] sm:$0xff]  ;;  %v55_v34 = vld [vmem:[%s2322_s0 + $0xe8] sm:$0xff]  ;;  %v41_v35 = vld [vmem:[%s2322_s0 + $0x78] sm:$0xff] }
   0xd   :  { %1442 = vmatprep.mubr.msk.f32.mxu1 %vm67_vm0, %v46_v12  ;;  %1465 = vmatpush3.msra.mxu1 %v426_v20  ;;  %v56_v36 = vld [vmem:[%s2322_s0 + $0xf0] sm:$0xff]  ;;  %v57_v37 = vld [vmem:[%s2322_s0 + $0xf8] sm:$0xff]  ;;  %v422_v40 = vld [vmem:[%s2323_s3 + $0x8] sm:$0xff] }
   0xe   :  { %1419 = vmatmul.mubr.msk.f32.gmra.mxu0 %vm67_vm0, %v31_v11  ;;  %1466 = vmatprep.subr.mxu1 %v425_v25  ;;  %v424_v38 = vld [vmem:[%s2323_s3 + $0x18] sm:$0xff]  ;;  %v423_v39 = vld [vmem:[%s2323_s3 + $0x10] sm:$0xff]  ;;  %v421_v41 = vld [vmem:[%s2323_s3] sm:$0xff] }
   0xf   :  { %1421 = vmatprep.mubr.msk.f32.mxu0 %vm67_vm0, %v32_v13  ;;  %1467 = vmatpush3.msra.mxu1 %v425_v25  ;;  %v797_v42 = vld [vmem:[%s2324_s5 + $0x38] sm:$0xff]  ;;  %v796_v43 = vld [vmem:[%s2324_s5 + $0x30] sm:$0xff]  ;;  %v795_v44 = vld [vmem:[%s2324_s5 + $0x28] sm:$0xff] }
  0x10   :  { %1443 = vmatmul.mubr.msk.f32.gmra.mxu1 %vm67_vm0, %v47_v16  ;;  %1468 = vmatprep.subr.mxu1 %v424_v38  ;;  %v794_v45 = vld [vmem:[%s2324_s5 + $0x20] sm:$0xff] }
  0x11   :  { %1445 = vmatprep.mubr.msk.f32.mxu1 %vm67_vm0, %v48_v18  ;;  %1469 = vmatpush3.msra.mxu1 %v424_v38  ;;  %v1997_v46 = vld [vmem:[%s2325_s2] ss:$0 sm:$0xff] }
  0x12   :  { %1422 = vmatmul.mubr.msk.f32.gmra.mxu0 %vm67_vm0, %v33_v17  ;;  %1470 = vmatprep.subr.mxu1 %v423_v39 }
  0x13   :  { %1424 = vmatprep.mubr.msk.f32.mxu0 %vm67_vm0, %v34_v19  ;;  %1471 = vmatpush3.msra.mxu1 %v423_v39 }
  0x14   :  { %1446 = vmatmul.mubr.msk.f32.gmra.mxu1 %vm67_vm0, %v49_v21  ;;  %1472 = vmatprep.subr.mxu1 %v422_v40 }
  0x15   :  { %1448 = vmatprep.mubr.msk.f32.mxu1 %vm67_vm0, %v50_v23  ;;  %1473 = vmatpush3.msra.mxu1 %v422_v40 }
  0x16   :  { %1425 = vmatmul.mubr.msk.f32.gmra.mxu0 %vm67_vm0, %v35_v22  ;;  %1474 = vmatprep.subr.mxu1 %v421_v41 }
  0x17   :  { %1427 = vmatprep.mubr.msk.f32.mxu0 %vm67_vm0, %v36_v24  ;;  %1475 = vmatpush3.msra.mxu1 %v421_v41 }
  0x18   :  { %1449 = vmatmul.mubr.msk.f32.gmra.mxu1 %vm67_vm0, %v51_v26  ;;  %1524 = vmatprep.subr.mxu0 %v797_v42 }
  0x19   :  { %1451 = vmatprep.mubr.msk.f32.mxu1 %vm67_vm0, %v52_v28  ;;  %1525 = vmatpush3.msra.mxu0 %v797_v42 }
  0x1a   :  { %1428 = vmatmul.mubr.msk.f32.gmra.mxu0 %vm67_vm0, %v37_v27  ;;  %1526 = vmatprep.subr.mxu0 %v796_v43 }
  0x1b   :  { %1430 = vmatprep.mubr.msk.f32.mxu0 %vm67_vm0, %v38_v29  ;;  %1527 = vmatpush3.msra.mxu0 %v796_v43 }
  0x1c   :  { %1452 = vmatmul.mubr.msk.f32.gmra.mxu1 %vm67_vm0, %v53_v30  ;;  %1528 = vmatprep.subr.mxu0 %v795_v44 }
  0x1d   :  { %1454 = vmatprep.mubr.msk.f32.mxu1 %vm67_vm0, %v54_v32  ;;  %1529 = vmatpush3.msra.mxu0 %v795_v44 }
  0x1e   :  { %1431 = vmatmul.mubr.msk.f32.gmra.mxu0 %vm67_vm0, %v39_v31  ;;  %1530 = vmatprep.subr.mxu0 %v794_v45 }
  0x1f   :  { %1433 = vmatprep.mubr.msk.f32.mxu0 %vm67_vm0, %v40_v33  ;;  %1531 = vmatpush3.msra.mxu0 %v794_v45 }
  0x20   :  { %1455 = vmatmul.mubr.msk.f32.gmra.mxu1 %vm67_vm0, %v55_v34 }
  0x21   :  { %1457 = vmatprep.mubr.msk.f32.mxu1 %vm67_vm0, %v56_v36 }
  0x22   :  { %1434 = vmatmul.mubr.msk.f32.gmra.mxu0 %vm67_vm0, %v41_v35 }
  0x24   :  { %1458 = vmatmul.mubr.msk.f32.gmra.mxu1 %vm67_vm0, %v57_v37 }
  0xc6   :  { %v1414_v47 = vpop.f32.mrf.mxu0 }
  0xc7   :  { %v236_v48 = vadd.f32 %v1414_v47, %v1997_v46 }
  0xc8   :  { %v230_v49 = vpop.f32.mrf.mxu0  ;;  %v2001_v51 = vpop.f32.mrf.mxu1 }
  0xc9   :  { %v231_v50 = vadd.f32 %v1997_v46, %v230_v49  ;;  %v316_v36 = vadd.f32 %v2001_v51, %v1997_v46 }
  0xca   :  { %v1417_v52 = vpop.f32.mrf.mxu0  ;;  %v310_v53 = vpop.f32.mrf.mxu1 }
  0xcb   :  { %1592 = vtanh.f32 %v231_v50  ;;  %v246_v54 = vadd.f32 %v1417_v52, %v1997_v46  ;;  %v311_v27 = vadd.f32 %v1997_v46, %v310_v53 }
  0xcc   :  { %1594 = vtanh.f32 %v236_v48  ;;  %v240_v55 = vpop.f32.mrf.mxu0  ;;  %v2005_v57 = vpop.f32.mrf.mxu1 }
  0xcd   :  { %v241_v56 = vadd.f32 %v1997_v46, %v240_v55  ;;  %v326_v41 = vadd.f32 %v2005_v57, %v1997_v46 }
  0xce   :  { %v1420_v58 = vpop.f32.mrf.mxu0  ;;  %v320_v59 = vpop.f32.mrf.mxu1 }
  0xcf   :  { %1596 = vtanh.f32 %v241_v56  ;;  %v256_v60 = vadd.f32 %v1420_v58, %v1997_v46  ;;  %v321_v34 = vadd.f32 %v1997_v46, %v320_v59 }
  0xd0   :  { %1598 = vtanh.f32 %v246_v54  ;;  %v250_v61 = vpop.f32.mrf.mxu0  ;;  %v2009_v63 = vpop.f32.mrf.mxu1 }
  0xd1   :  { %v251_v62 = vadd.f32 %v1997_v46, %v250_v61  ;;  %v336_v47 = vadd.f32 %v2009_v63, %v1997_v46 }
  0xd2   :  { %v1423_v0 = vpop.f32.mrf.mxu0  ;;  %v330_v3 = vpop.f32.mrf.mxu1 }
  0xd3   :  { %1600 = vtanh.f32 %v251_v62  ;;  %v266_v1 = vadd.f32 %v1423_v0, %v1997_v46  ;;  %v331_v39 = vadd.f32 %v1997_v46, %v330_v3 }
  0xd4   :  { %1602 = vtanh.f32 %v256_v60  ;;  %v260_v2 = vpop.f32.mrf.mxu0  ;;  %v2014_v9 = vpop.f32.mrf.mxu1 }
  0xd5   :  { %v261_v4 = vadd.f32 %v1997_v46, %v260_v2  ;;  %v346_v53 = vadd.f32 %v2014_v9, %v1997_v46 }
  0xd6   :  { %v1426_v5 = vpop.f32.mrf.mxu0  ;;  %v340_v16 = vpop.f32.mrf.mxu1 }
  0xd7   :  { %1604 = vtanh.f32 %v261_v4  ;;  %v276_v7 = vadd.f32 %v1426_v5, %v1997_v46  ;;  %v341_v44 = vadd.f32 %v1997_v46, %v340_v16  ;;  %v792_v16 = vld [vmem:[%s2324_s5 + $0x10] sm:$0xff] }
  0xd8   :  { %v1593_v6 = vpop.eup %1592  ;;  %1606 = vtanh.f32 %v266_v1  ;;  %v270_v8 = vpop.f32.mrf.mxu0 }
  0xd9   :  { %v1595_v10 = vpop.eup %1594  ;;  %v271_v11 = vadd.f32 %v1997_v46, %v270_v8  ;;  %1476 = vmatprep.mubr.msk.f32.mxu1 %vm436_vm1, %v1593_v6  ;;  %v1450_v23 = vpop.f32.mrf.mxu1 }
  0xda   :  { %v1429_v12 = vpop.f32.mrf.mxu0  ;;  %1477 = vmatmul.mubr.msk.f32.vlgmr.msra.gmra.mxu1 %vm436_vm1, %v1595_v10  ;;  %v356_v58 = vadd.f32 %v1450_v23, %v1997_v46 }
  0xdb   :  { %1608 = vtanh.f32 %v271_v11  ;;  %v286_v14 = vadd.f32 %v1429_v12, %v1997_v46  ;;  %v350_v31 = vpop.f32.mrf.mxu1 }
  0xdc   :  { %v1597_v13 = vpop.eup %1596  ;;  %1610 = vtanh.f32 %v276_v7  ;;  %v280_v15 = vpop.f32.mrf.mxu0  ;;  %v351_v51 = vadd.f32 %v1997_v46, %v350_v31 }
  0xdd   :  { %v1599_v17 = vpop.eup %1598  ;;  %v281_v18 = vadd.f32 %v1997_v46, %v280_v15  ;;  %1479 = vmatprep.mubr.msk.f32.mxu1 %vm436_vm1, %v1597_v13  ;;  %v1453_v37 = vpop.f32.mrf.mxu1  ;;  %v793_v15 = vld [vmem:[%s2324_s5 + $0x18] sm:$0xff] }
  0xde   :  { %v1432_v19 = vpop.f32.mrf.mxu0  ;;  %1480 = vmatmul.mubr.msk.f32.gmra.mxu1 %vm436_vm1, %v1599_v17  ;;  %v366_v63 = vadd.f32 %v1453_v37, %v1997_v46  ;;  %1532 = vmatprep.subr.mxu0 %v793_v15  ;;  %v791_v17 = vld [vmem:[%s2324_s5 + $0x8] sm:$0xff] }
  0xdf   :  { %1612 = vtanh.f32 %v281_v18  ;;  %v296_v21 = vadd.f32 %v1432_v19, %v1997_v46  ;;  %v360_v42 = vpop.f32.mrf.mxu1  ;;  %1533 = vmatpush3.msra.mxu0 %v793_v15  ;;  %v790_v18 = vld [vmem:[%s2324_s5] sm:$0xff] }
  0xe0   :  { %v1601_v20 = vpop.eup %1600  ;;  %1614 = vtanh.f32 %v286_v14  ;;  %v290_v22 = vpop.f32.mrf.mxu0  ;;  %v361_v56 = vadd.f32 %v1997_v46, %v360_v42  ;;  %1534 = vmatprep.subr.mxu0 %v792_v16  ;;  %v2090_v19 = vld [vmem:[%s2326_s4] ss:$0 sm:$0xff] }
  0xe1   :  { %v1603_v24 = vpop.eup %1602  ;;  %v291_v25 = vadd.f32 %v1997_v46, %v290_v22  ;;  %1482 = vmatprep.mubr.msk.f32.mxu1 %vm436_vm1, %v1601_v20  ;;  %v1456_v48 = vpop.f32.mrf.mxu1  ;;  %1535 = vmatpush3.msra.mxu0 %v792_v16 }
  0xe2   :  { %v1435_v26 = vpop.f32.mrf.mxu0  ;;  %1483 = vmatmul.mubr.msk.f32.gmra.mxu1 %vm436_vm1, %v1603_v24  ;;  %v376_v4 = vadd.f32 %v1456_v48, %v1997_v46  ;;  %1536 = vmatprep.subr.mxu0 %v791_v17 }
  0xe3   :  { %1616 = vtanh.f32 %v291_v25  ;;  %v306_v29 = vadd.f32 %v1435_v26, %v1997_v46  ;;  %v370_v54 = vpop.f32.mrf.mxu1  ;;  %1537 = vmatpush3.msra.mxu0 %v791_v17 }
  0xe4   :  { %v1605_v28 = vpop.eup %1604  ;;  %1618 = vtanh.f32 %v296_v21  ;;  %v300_v30 = vpop.f32.mrf.mxu0  ;;  %v371_v61 = vadd.f32 %v1997_v46, %v370_v54  ;;  %1538 = vmatprep.subr.mxu0 %v790_v18 }
  0xe5   :  { %v1607_v32 = vpop.eup %1606  ;;  %v301_v33 = vadd.f32 %v1997_v46, %v300_v30  ;;  %1485 = vmatprep.mubr.msk.f32.mxu1 %vm436_vm1, %v1605_v28  ;;  %1620 = vtanh.f32 %v311_v27  ;;  %v1459_v59 = vpop.f32.mrf.mxu1  ;;  %1539 = vmatpush3.msra.mxu0 %v790_v18 }
  0xe6   :  { %1486 = vmatmul.mubr.msk.f32.gmra.mxu1 %vm436_vm1, %v1607_v32  ;;  %v386_v7 = vadd.f32 %v1459_v59, %v1997_v46 }
  0xe7   :  { %1622 = vtanh.f32 %v301_v33  ;;  %v380_v0 = vpop.f32.mrf.mxu1 }
  0xe8   :  { %v1609_v35 = vpop.eup %1608  ;;  %1624 = vtanh.f32 %v306_v29  ;;  %v381_v2 = vadd.f32 %v1997_v46, %v380_v0 }
  0xe9   :  { %v1611_v38 = vpop.eup %1610  ;;  %1488 = vmatprep.mubr.msk.f32.mxu1 %vm436_vm1, %v1609_v35  ;;  %1626 = vtanh.f32 %v321_v34 }
  0xea   :  { %1489 = vmatmul.mubr.msk.f32.gmra.mxu1 %vm436_vm1, %v1611_v38  ;;  %1628 = vtanh.f32 %v316_v36 }
  0xeb   :  { %1630 = vtanh.f32 %v331_v39 }
  0xec   :  { %v1613_v40 = vpop.eup %1612  ;;  %1632 = vtanh.f32 %v326_v41 }
  0xed   :  { %v1615_v43 = vpop.eup %1614  ;;  %1491 = vmatprep.mubr.msk.f32.mxu1 %vm436_vm1, %v1613_v40  ;;  %1634 = vtanh.f32 %v341_v44 }
  0xee   :  { %1492 = vmatmul.mubr.msk.f32.gmra.mxu1 %vm436_vm1, %v1615_v43  ;;  %1636 = vtanh.f32 %v336_v47 }
  0xef   :  { %1638 = vtanh.f32 %v351_v51 }
  0xf0   :  { %v1617_v45 = vpop.eup %1616  ;;  %1640 = vtanh.f32 %v346_v53 }
  0xf1   :  { %v1619_v49 = vpop.eup %1618  ;;  %1494 = vmatprep.mubr.msk.f32.mxu1 %vm436_vm1, %v1617_v45  ;;  %1642 = vtanh.f32 %v361_v56 }
  0xf2   :  { %1495 = vmatmul.mubr.msk.f32.gmra.mxu1 %vm436_vm1, %v1619_v49  ;;  %v1621_v50 = vpop.eup %1620  ;;  %1644 = vtanh.f32 %v356_v58 }
  0xf3   :  { %1646 = vtanh.f32 %v371_v61 }
  0xf4   :  { %v1623_v52 = vpop.eup %1622  ;;  %1648 = vtanh.f32 %v366_v63 }
  0xf5   :  { %v1625_v55 = vpop.eup %1624  ;;  %1497 = vmatprep.mubr.msk.f32.mxu1 %vm436_vm1, %v1623_v52  ;;  %1650 = vtanh.f32 %v381_v2 }
  0xf6   :  { %1498 = vmatmul.mubr.msk.f32.gmra.mxu1 %vm436_vm1, %v1625_v55  ;;  %v1627_v57 = vpop.eup %1626  ;;  %1652 = vtanh.f32 %v376_v4 }
  0xf7   :  { %1500 = vmatprep.mubr.msk.f32.mxu1 %vm436_vm1, %v1621_v50  ;;  %v1629_v60 = vpop.eup %1628  ;;  %1654 = vtanh.f32 %v386_v7 }
  0xf8   :  { %v1631_v62 = vpop.eup %1630 }
  0xf9   :  { %v1633_v1 = vpop.eup %1632 }
  0xfa   :  { %1501 = vmatmul.mubr.msk.f32.gmra.mxu1 %vm436_vm1, %v1629_v60  ;;  %v1635_v3 = vpop.eup %1634 }
  0xfb   :  { %1503 = vmatprep.mubr.msk.f32.mxu1 %vm436_vm1, %v1627_v57  ;;  %v1637_v5 = vpop.eup %1636 }
  0xfc   :  { %v1639_v6 = vpop.eup %1638 }
  0xfd   :  { %v1641_v8 = vpop.eup %1640 }
  0xfe   :  { %1504 = vmatmul.mubr.msk.f32.gmra.mxu1 %vm436_vm1, %v1633_v1  ;;  %v1643_v9 = vpop.eup %1642 }
  0xff   :  { %1506 = vmatprep.mubr.msk.f32.mxu1 %vm436_vm1, %v1631_v62  ;;  %v1645_v10 = vpop.eup %1644 }
 0x100   :  { %v1647_v11 = vpop.eup %1646 }
 0x101   :  { %v1649_v12 = vpop.eup %1648 }
 0x102   :  { %1507 = vmatmul.mubr.msk.f32.gmra.mxu1 %vm436_vm1, %v1637_v5  ;;  %v1651_v13 = vpop.eup %1650 }
 0x103   :  { %1509 = vmatprep.mubr.msk.f32.mxu1 %vm436_vm1, %v1635_v3  ;;  %v1653_v46 = vpop.eup %1652 }
 0x104   :  { %v1655_v14 = vpop.eup %1654 }
 0x106   :  { %1510 = vmatmul.mubr.msk.f32.gmra.mxu1 %vm436_vm1, %v1641_v8 }
 0x107   :  { %1512 = vmatprep.mubr.msk.f32.mxu1 %vm436_vm1, %v1639_v6 }
 0x10a   :  { %1513 = vmatmul.mubr.msk.f32.gmra.mxu1 %vm436_vm1, %v1645_v10 }
 0x10b   :  { %1515 = vmatprep.mubr.msk.f32.mxu1 %vm436_vm1, %v1643_v9 }
 0x10e   :  { %1516 = vmatmul.mubr.msk.f32.gmra.mxu1 %vm436_vm1, %v1649_v12 }
 0x10f   :  { %1518 = vmatprep.mubr.msk.f32.mxu1 %vm436_vm1, %v1647_v11 }
 0x112   :  { %1519 = vmatmul.mubr.msk.f32.gmra.mxu1 %vm436_vm1, %v1653_v46 }
 0x113   :  { %1521 = vmatprep.mubr.msk.f32.mxu1 %vm436_vm1, %v1651_v13 }
 0x116   :  { %1522 = vmatmul.mubr.msk.f32.gmra.mxu1 %vm436_vm1, %v1655_v14 }
 0x19a   :  { %v1478_v20 = vpop.f32.mrf.mxu1 }
 0x19b   :  { %v605_v21 = vadd.f32 %v1478_v20, %v2090_v19 }
 0x19c   :  { %v599_v22 = vpop.f32.mrf.mxu1 }
 0x19d   :  { %v600_v23 = vadd.f32 %v2090_v19, %v599_v22 }
 0x19e   :  { %v1481_v24 = vpop.f32.mrf.mxu1 }
 0x19f   :  { %1656 = vtanh.f32 %v600_v23  ;;  %v615_v25 = vadd.f32 %v1481_v24, %v2090_v19 }
 0x1a0   :  { %1658 = vtanh.f32 %v605_v21  ;;  %v609_v26 = vpop.f32.mrf.mxu1 }
 0x1a1   :  { %v610_v27 = vadd.f32 %v2090_v19, %v609_v26 }
 0x1a2   :  { %v1484_v28 = vpop.f32.mrf.mxu1 }
 0x1a3   :  { %1660 = vtanh.f32 %v610_v27  ;;  %v625_v29 = vadd.f32 %v1484_v28, %v2090_v19 }
 0x1a4   :  { %1662 = vtanh.f32 %v615_v25  ;;  %v619_v30 = vpop.f32.mrf.mxu1 }
 0x1a5   :  { %v620_v31 = vadd.f32 %v2090_v19, %v619_v30 }
 0x1a6   :  { %v1487_v32 = vpop.f32.mrf.mxu1 }
 0x1a7   :  { %1664 = vtanh.f32 %v620_v31  ;;  %v635_v33 = vadd.f32 %v1487_v32, %v2090_v19 }
 0x1a8   :  { %1666 = vtanh.f32 %v625_v29  ;;  %v629_v34 = vpop.f32.mrf.mxu1 }
 0x1a9   :  { %v630_v35 = vadd.f32 %v2090_v19, %v629_v34 }
 0x1aa   :  { %v1490_v36 = vpop.f32.mrf.mxu1 }
 0x1ab   :  { %1668 = vtanh.f32 %v630_v35  ;;  %v645_v38 = vadd.f32 %v1490_v36, %v2090_v19 }
 0x1ac   :  { %v1657_v37 = vpop.eup %1656  ;;  %1670 = vtanh.f32 %v635_v33  ;;  %v639_v39 = vpop.f32.mrf.mxu1 }
 0x1ad   :  { %v1659_v40 = vpop.eup %1658  ;;  %v640_v41 = vadd.f32 %v2090_v19, %v639_v39  ;;  %1540 = vmatprep.mubr.msk.f32.mxu0 %vm436_vm1, %v1657_v37 }
 0x1ae   :  { %v1493_v42 = vpop.f32.mrf.mxu1  ;;  %1541 = vmatmul.mubr.msk.f32.vlgmr.msra.gmra.mxu0 %vm436_vm1, %v1659_v40 }
 0x1af   :  { %1672 = vtanh.f32 %v640_v41  ;;  %v655_v44 = vadd.f32 %v1493_v42, %v2090_v19 }
 0x1b0   :  { %v1661_v43 = vpop.eup %1660  ;;  %1674 = vtanh.f32 %v645_v38  ;;  %v649_v45 = vpop.f32.mrf.mxu1 }
 0x1b1   :  { %v1663_v47 = vpop.eup %1662  ;;  %v650_v48 = vadd.f32 %v2090_v19, %v649_v45  ;;  %1543 = vmatprep.mubr.msk.f32.mxu0 %vm436_vm1, %v1661_v43 }
 0x1b2   :  { %v1496_v49 = vpop.f32.mrf.mxu1  ;;  %1544 = vmatmul.mubr.msk.f32.gmra.mxu0 %vm436_vm1, %v1663_v47 }
 0x1b3   :  { %1676 = vtanh.f32 %v650_v48  ;;  %v665_v51 = vadd.f32 %v1496_v49, %v2090_v19 }
 0x1b4   :  { %v1665_v50 = vpop.eup %1664  ;;  %1678 = vtanh.f32 %v655_v44  ;;  %v659_v52 = vpop.f32.mrf.mxu1 }
 0x1b5   :  { %v1667_v53 = vpop.eup %1666  ;;  %v660_v54 = vadd.f32 %v2090_v19, %v659_v52  ;;  %1546 = vmatprep.mubr.msk.f32.mxu0 %vm436_vm1, %v1665_v50 }
 0x1b6   :  { %v1499_v55 = vpop.f32.mrf.mxu1  ;;  %1547 = vmatmul.mubr.msk.f32.gmra.mxu0 %vm436_vm1, %v1667_v53  ;;  %v2159_v53 = vld [vmem:[%s2327_s6] ss:$0 sm:$0xff] }
 0x1b7   :  { %1680 = vtanh.f32 %v660_v54  ;;  %v675_v57 = vadd.f32 %v1499_v55, %v2090_v19 }
 0x1b8   :  { %v1669_v56 = vpop.eup %1668  ;;  %1682 = vtanh.f32 %v665_v51  ;;  %v669_v58 = vpop.f32.mrf.mxu1 }
 0x1b9   :  { %v1671_v59 = vpop.eup %1670  ;;  %v670_v60 = vadd.f32 %v2090_v19, %v669_v58  ;;  %1549 = vmatprep.mubr.msk.f32.mxu0 %vm436_vm1, %v1669_v56 }
 0x1ba   :  { %v1502_v61 = vpop.f32.mrf.mxu1  ;;  %1550 = vmatmul.mubr.msk.f32.gmra.mxu0 %vm436_vm1, %v1671_v59 }
 0x1bb   :  { %1684 = vtanh.f32 %v670_v60  ;;  %v685_v63 = vadd.f32 %v1502_v61, %v2090_v19 }
 0x1bc   :  { %v1673_v62 = vpop.eup %1672  ;;  %1686 = vtanh.f32 %v675_v57  ;;  %v679_v0 = vpop.f32.mrf.mxu1 }
 0x1bd   :  { %v1675_v1 = vpop.eup %1674  ;;  %v680_v2 = vadd.f32 %v2090_v19, %v679_v0  ;;  %1552 = vmatprep.mubr.msk.f32.mxu0 %vm436_vm1, %v1673_v62 }
 0x1be   :  { %v1505_v3 = vpop.f32.mrf.mxu1  ;;  %1553 = vmatmul.mubr.msk.f32.gmra.mxu0 %vm436_vm1, %v1675_v1 }
 0x1bf   :  { %1688 = vtanh.f32 %v680_v2  ;;  %v695_v5 = vadd.f32 %v1505_v3, %v2090_v19 }
 0x1c0   :  { %v1677_v4 = vpop.eup %1676  ;;  %1690 = vtanh.f32 %v685_v63  ;;  %v689_v6 = vpop.f32.mrf.mxu1 }
 0x1c1   :  { %v1679_v7 = vpop.eup %1678  ;;  %v690_v8 = vadd.f32 %v2090_v19, %v689_v6  ;;  %1555 = vmatprep.mubr.msk.f32.mxu0 %vm436_vm1, %v1677_v4 }
 0x1c2   :  { %v1508_v9 = vpop.f32.mrf.mxu1  ;;  %1556 = vmatmul.mubr.msk.f32.gmra.mxu0 %vm436_vm1, %v1679_v7 }
 0x1c3   :  { %1692 = vtanh.f32 %v690_v8  ;;  %v705_v11 = vadd.f32 %v1508_v9, %v2090_v19 }
 0x1c4   :  { %v1681_v10 = vpop.eup %1680  ;;  %1694 = vtanh.f32 %v695_v5  ;;  %v699_v12 = vpop.f32.mrf.mxu1 }
 0x1c5   :  { %v1683_v13 = vpop.eup %1682  ;;  %v700_v46 = vadd.f32 %v2090_v19, %v699_v12  ;;  %1558 = vmatprep.mubr.msk.f32.mxu0 %vm436_vm1, %v1681_v10 }
 0x1c6   :  { %v1511_v14 = vpop.f32.mrf.mxu1  ;;  %1559 = vmatmul.mubr.msk.f32.gmra.mxu0 %vm436_vm1, %v1683_v13 }
 0x1c7   :  { %1696 = vtanh.f32 %v700_v46  ;;  %v715_v16 = vadd.f32 %v1511_v14, %v2090_v19 }
 0x1c8   :  { %v1685_v15 = vpop.eup %1684  ;;  %1698 = vtanh.f32 %v705_v11  ;;  %v709_v17 = vpop.f32.mrf.mxu1 }
 0x1c9   :  { %v1687_v18 = vpop.eup %1686  ;;  %v710_v20 = vadd.f32 %v2090_v19, %v709_v17  ;;  %1561 = vmatprep.mubr.msk.f32.mxu0 %vm436_vm1, %v1685_v15 }
 0x1ca   :  { %v1514_v21 = vpop.f32.mrf.mxu1  ;;  %1562 = vmatmul.mubr.msk.f32.gmra.mxu0 %vm436_vm1, %v1687_v18 }
 0x1cb   :  { %1700 = vtanh.f32 %v710_v20  ;;  %v725_v23 = vadd.f32 %v1514_v21, %v2090_v19 }
 0x1cc   :  { %v1689_v22 = vpop.eup %1688  ;;  %1702 = vtanh.f32 %v715_v16  ;;  %v719_v24 = vpop.f32.mrf.mxu1 }
 0x1cd   :  { %v1691_v25 = vpop.eup %1690  ;;  %v720_v26 = vadd.f32 %v2090_v19, %v719_v24  ;;  %1564 = vmatprep.mubr.msk.f32.mxu0 %vm436_vm1, %v1689_v22 }
 0x1ce   :  { %v1517_v27 = vpop.f32.mrf.mxu1  ;;  %1565 = vmatmul.mubr.msk.f32.gmra.mxu0 %vm436_vm1, %v1691_v25 }
 0x1cf   :  { %1704 = vtanh.f32 %v720_v26  ;;  %v735_v29 = vadd.f32 %v1517_v27, %v2090_v19 }
 0x1d0   :  { %v1693_v28 = vpop.eup %1692  ;;  %1706 = vtanh.f32 %v725_v23  ;;  %v729_v30 = vpop.f32.mrf.mxu1 }
 0x1d1   :  { %v1695_v31 = vpop.eup %1694  ;;  %v730_v32 = vadd.f32 %v2090_v19, %v729_v30  ;;  %1567 = vmatprep.mubr.msk.f32.mxu0 %vm436_vm1, %v1693_v28 }
 0x1d2   :  { %v1520_v33 = vpop.f32.mrf.mxu1  ;;  %1568 = vmatmul.mubr.msk.f32.gmra.mxu0 %vm436_vm1, %v1695_v31 }
 0x1d3   :  { %1708 = vtanh.f32 %v730_v32  ;;  %v745_v35 = vadd.f32 %v1520_v33, %v2090_v19 }
 0x1d4   :  { %v1697_v34 = vpop.eup %1696  ;;  %1710 = vtanh.f32 %v735_v29  ;;  %v739_v36 = vpop.f32.mrf.mxu1 }
 0x1d5   :  { %v1699_v37 = vpop.eup %1698  ;;  %v740_v38 = vadd.f32 %v2090_v19, %v739_v36  ;;  %1570 = vmatprep.mubr.msk.f32.mxu0 %vm436_vm1, %v1697_v34 }
 0x1d6   :  { %v1523_v39 = vpop.f32.mrf.mxu1  ;;  %1571 = vmatmul.mubr.msk.f32.gmra.mxu0 %vm436_vm1, %v1699_v37 }
 0x1d7   :  { %1712 = vtanh.f32 %v740_v38  ;;  %v755_v41 = vadd.f32 %v1523_v39, %v2090_v19 }
 0x1d8   :  { %v1701_v40 = vpop.eup %1700  ;;  %1714 = vtanh.f32 %v745_v35  ;;  %v749_v42 = vpop.f32.mrf.mxu1 }
 0x1d9   :  { %v1703_v43 = vpop.eup %1702  ;;  %v750_v44 = vadd.f32 %v2090_v19, %v749_v42  ;;  %1573 = vmatprep.mubr.msk.f32.mxu0 %vm436_vm1, %v1701_v40 }
 0x1da   :  { %1574 = vmatmul.mubr.msk.f32.gmra.mxu0 %vm436_vm1, %v1703_v43 }
 0x1db   :  { %1716 = vtanh.f32 %v750_v44 }
 0x1dc   :  { %v1705_v45 = vpop.eup %1704  ;;  %1718 = vtanh.f32 %v755_v41 }
 0x1dd   :  { %v1707_v47 = vpop.eup %1706  ;;  %1576 = vmatprep.mubr.msk.f32.mxu0 %vm436_vm1, %v1705_v45 }
 0x1de   :  { %1577 = vmatmul.mubr.msk.f32.gmra.mxu0 %vm436_vm1, %v1707_v47 }
 0x1e0   :  { %v1709_v48 = vpop.eup %1708 }
 0x1e1   :  { %v1711_v49 = vpop.eup %1710  ;;  %1579 = vmatprep.mubr.msk.f32.mxu0 %vm436_vm1, %v1709_v48 }
 0x1e2   :  { %1580 = vmatmul.mubr.msk.f32.gmra.mxu0 %vm436_vm1, %v1711_v49 }
 0x1e4   :  { %v1713_v50 = vpop.eup %1712 }
 0x1e5   :  { %v1715_v19 = vpop.eup %1714  ;;  %1582 = vmatprep.mubr.msk.f32.mxu0 %vm436_vm1, %v1713_v50 }
 0x1e6   :  { %1583 = vmatmul.mubr.msk.f32.gmra.mxu0 %vm436_vm1, %v1715_v19 }
 0x1e8   :  { %v1717_v51 = vpop.eup %1716 }
 0x1e9   :  { %v1719_v52 = vpop.eup %1718  ;;  %1585 = vmatprep.mubr.msk.f32.mxu0 %vm436_vm1, %v1717_v51 }
 0x1ea   :  { %1586 = vmatmul.mubr.msk.f32.gmra.mxu0 %vm436_vm1, %v1719_v52 }
 0x26e   :  { %v1542_v54 = vpop.f32.mrf.mxu0 }
 0x26f   :  { %v973_v55 = vadd.f32 %v1542_v54, %v2159_v53 }
 0x270   :  { %v967_v56 = vpop.f32.mrf.mxu0 }
 0x271   :  { %1720 = vtanh.f32 %v973_v55  ;;  %v968_v57 = vadd.f32 %v2159_v53, %v967_v56 }
 0x272   :  { %v1545_v58 = vpop.f32.mrf.mxu0 }
 0x273   :  { %1722 = vtanh.f32 %v968_v57  ;;  %v983_v59 = vadd.f32 %v1545_v58, %v2159_v53 }
 0x274   :  { %v977_v60 = vpop.f32.mrf.mxu0 }
 0x275   :  { %1724 = vtanh.f32 %v983_v59  ;;  %v978_v61 = vadd.f32 %v2159_v53, %v977_v60 }
 0x276   :  { %v1548_v62 = vpop.f32.mrf.mxu0 }
 0x277   :  { %1726 = vtanh.f32 %v978_v61  ;;  %v993_v63 = vadd.f32 %v1548_v62, %v2159_v53 }
 0x278   :  { %v987_v0 = vpop.f32.mrf.mxu0 }
 0x279   :  { %1728 = vtanh.f32 %v993_v63  ;;  %v988_v1 = vadd.f32 %v2159_v53, %v987_v0 }
 0x27a   :  { %v1551_v2 = vpop.f32.mrf.mxu0 }
 0x27b   :  { %1730 = vtanh.f32 %v988_v1  ;;  %v1003_v3 = vadd.f32 %v1551_v2, %v2159_v53 }
 0x27c   :  { %v997_v4 = vpop.f32.mrf.mxu0 }
 0x27d   :  { %1732 = vtanh.f32 %v1003_v3  ;;  %v998_v5 = vadd.f32 %v2159_v53, %v997_v4 }
 0x27e   :  { %v1721_v6 = vpop.eup %1720  ;;  %v1554_v7 = vpop.f32.mrf.mxu0 }
 0x27f   :  { %1160 = vst.msk [vmem:[%s2328_s7 + $0x8] sm:$0xff] %vm1158_vm2, %v1721_v6  ;;  %1734 = vtanh.f32 %v998_v5  ;;  %v1013_v8 = vadd.f32 %v1554_v7, %v2159_v53 }
 0x280   :  { %v1723_v9 = vpop.eup %1722  ;;  %v1007_v10 = vpop.f32.mrf.mxu0 }
 0x281   :  { %1159 = vst.msk [vmem:[%s2328_s7] sm:$0xff] %vm1158_vm2, %v1723_v9  ;;  %1736 = vtanh.f32 %v1013_v8  ;;  %v1008_v11 = vadd.f32 %v2159_v53, %v1007_v10 }
 0x282   :  { %v1725_v12 = vpop.eup %1724  ;;  %v1557_v13 = vpop.f32.mrf.mxu0 }
 0x283   :  { %1162 = vst.msk [vmem:[%s2328_s7 + $0x18] sm:$0xff] %vm1158_vm2, %v1725_v12  ;;  %1738 = vtanh.f32 %v1008_v11  ;;  %v1023_v46 = vadd.f32 %v1557_v13, %v2159_v53 }
 0x284   :  { %v1727_v14 = vpop.eup %1726  ;;  %v1017_v15 = vpop.f32.mrf.mxu0 }
 0x285   :  { %1161 = vst.msk [vmem:[%s2328_s7 + $0x10] sm:$0xff] %vm1158_vm2, %v1727_v14  ;;  %1740 = vtanh.f32 %v1023_v46  ;;  %v1018_v16 = vadd.f32 %v2159_v53, %v1017_v15 }
 0x286   :  { %v1729_v17 = vpop.eup %1728  ;;  %v1560_v18 = vpop.f32.mrf.mxu0 }
 0x287   :  { %1164 = vst.msk [vmem:[%s2328_s7 + $0x28] sm:$0xff] %vm1158_vm2, %v1729_v17  ;;  %1742 = vtanh.f32 %v1018_v16  ;;  %v1033_v20 = vadd.f32 %v1560_v18, %v2159_v53 }
 0x288   :  { %v1731_v21 = vpop.eup %1730  ;;  %v1027_v22 = vpop.f32.mrf.mxu0 }
 0x289   :  { %1163 = vst.msk [vmem:[%s2328_s7 + $0x20] sm:$0xff] %vm1158_vm2, %v1731_v21  ;;  %1744 = vtanh.f32 %v1033_v20  ;;  %v1028_v23 = vadd.f32 %v2159_v53, %v1027_v22 }
 0x28a   :  { %v1733_v24 = vpop.eup %1732  ;;  %v1563_v25 = vpop.f32.mrf.mxu0 }
 0x28b   :  { %1166 = vst.msk [vmem:[%s2328_s7 + $0x38] sm:$0xff] %vm1158_vm2, %v1733_v24  ;;  %1746 = vtanh.f32 %v1028_v23  ;;  %v1043_v26 = vadd.f32 %v1563_v25, %v2159_v53 }
 0x28c   :  { %v1735_v27 = vpop.eup %1734  ;;  %v1037_v28 = vpop.f32.mrf.mxu0 }
 0x28d   :  { %1165 = vst.msk [vmem:[%s2328_s7 + $0x30] sm:$0xff] %vm1158_vm2, %v1735_v27  ;;  %1748 = vtanh.f32 %v1043_v26  ;;  %v1038_v29 = vadd.f32 %v2159_v53, %v1037_v28 }
 0x28e   :  { %v1737_v30 = vpop.eup %1736  ;;  %v1566_v31 = vpop.f32.mrf.mxu0 }
 0x28f   :  { %1168 = vst.msk [vmem:[%s2328_s7 + $0x48] sm:$0xff] %vm1158_vm2, %v1737_v30  ;;  %1750 = vtanh.f32 %v1038_v29  ;;  %v1053_v32 = vadd.f32 %v1566_v31, %v2159_v53 }
 0x290   :  { %v1739_v33 = vpop.eup %1738  ;;  %v1047_v34 = vpop.f32.mrf.mxu0 }
 0x291   :  { %1167 = vst.msk [vmem:[%s2328_s7 + $0x40] sm:$0xff] %vm1158_vm2, %v1739_v33  ;;  %1752 = vtanh.f32 %v1053_v32  ;;  %v1048_v35 = vadd.f32 %v2159_v53, %v1047_v34 }
 0x292   :  { %v1741_v36 = vpop.eup %1740  ;;  %v1569_v37 = vpop.f32.mrf.mxu0 }
 0x293   :  { %1170 = vst.msk [vmem:[%s2328_s7 + $0x58] sm:$0xff] %vm1158_vm2, %v1741_v36  ;;  %1754 = vtanh.f32 %v1048_v35  ;;  %v1063_v38 = vadd.f32 %v1569_v37, %v2159_v53 }
 0x294   :  { %v1743_v39 = vpop.eup %1742  ;;  %v1057_v40 = vpop.f32.mrf.mxu0 }
 0x295   :  { %1169 = vst.msk [vmem:[%s2328_s7 + $0x50] sm:$0xff] %vm1158_vm2, %v1743_v39  ;;  %1756 = vtanh.f32 %v1063_v38  ;;  %v1058_v41 = vadd.f32 %v2159_v53, %v1057_v40 }
 0x296   :  { %v1745_v42 = vpop.eup %1744  ;;  %v1572_v43 = vpop.f32.mrf.mxu0 }
 0x297   :  { %1172 = vst.msk [vmem:[%s2328_s7 + $0x68] sm:$0xff] %vm1158_vm2, %v1745_v42  ;;  %1758 = vtanh.f32 %v1058_v41  ;;  %v1073_v44 = vadd.f32 %v1572_v43, %v2159_v53 }
 0x298   :  { %v1747_v45 = vpop.eup %1746  ;;  %v1067_v47 = vpop.f32.mrf.mxu0 }
 0x299   :  { %1171 = vst.msk [vmem:[%s2328_s7 + $0x60] sm:$0xff] %vm1158_vm2, %v1747_v45  ;;  %1760 = vtanh.f32 %v1073_v44  ;;  %v1068_v48 = vadd.f32 %v2159_v53, %v1067_v47 }
 0x29a   :  { %v1749_v49 = vpop.eup %1748  ;;  %v1575_v50 = vpop.f32.mrf.mxu0 }
 0x29b   :  { %1174 = vst.msk [vmem:[%s2328_s7 + $0x78] sm:$0xff] %vm1158_vm2, %v1749_v49  ;;  %1762 = vtanh.f32 %v1068_v48  ;;  %v1083_v19 = vadd.f32 %v1575_v50, %v2159_v53 }
 0x29c   :  { %v1751_v51 = vpop.eup %1750  ;;  %v1077_v52 = vpop.f32.mrf.mxu0 }
 0x29d   :  { %1173 = vst.msk [vmem:[%s2328_s7 + $0x70] sm:$0xff] %vm1158_vm2, %v1751_v51  ;;  %1764 = vtanh.f32 %v1083_v19  ;;  %v1078_v54 = vadd.f32 %v2159_v53, %v1077_v52 }
 0x29e   :  { %v1753_v55 = vpop.eup %1752  ;;  %v1578_v56 = vpop.f32.mrf.mxu0 }
 0x29f   :  { %1176 = vst.msk [vmem:[%s2328_s7 + $0x88] sm:$0xff] %vm1158_vm2, %v1753_v55  ;;  %1766 = vtanh.f32 %v1078_v54  ;;  %v1093_v57 = vadd.f32 %v1578_v56, %v2159_v53 }
 0x2a0   :  { %v1755_v58 = vpop.eup %1754  ;;  %v1087_v59 = vpop.f32.mrf.mxu0 }
 0x2a1   :  { %1175 = vst.msk [vmem:[%s2328_s7 + $0x80] sm:$0xff] %vm1158_vm2, %v1755_v58  ;;  %1768 = vtanh.f32 %v1093_v57  ;;  %v1088_v60 = vadd.f32 %v2159_v53, %v1087_v59 }
 0x2a2   :  { %v1757_v61 = vpop.eup %1756  ;;  %v1581_v62 = vpop.f32.mrf.mxu0 }
 0x2a3   :  { %1178 = vst.msk [vmem:[%s2328_s7 + $0x98] sm:$0xff] %vm1158_vm2, %v1757_v61  ;;  %1770 = vtanh.f32 %v1088_v60  ;;  %v1103_v63 = vadd.f32 %v1581_v62, %v2159_v53 }
 0x2a4   :  { %v1759_v0 = vpop.eup %1758  ;;  %v1097_v1 = vpop.f32.mrf.mxu0 }
 0x2a5   :  { %1177 = vst.msk [vmem:[%s2328_s7 + $0x90] sm:$0xff] %vm1158_vm2, %v1759_v0  ;;  %1772 = vtanh.f32 %v1103_v63  ;;  %v1098_v2 = vadd.f32 %v2159_v53, %v1097_v1 }
 0x2a6   :  { %v1761_v3 = vpop.eup %1760  ;;  %v1584_v4 = vpop.f32.mrf.mxu0 }
 0x2a7   :  { %1180 = vst.msk [vmem:[%s2328_s7 + $0xa8] sm:$0xff] %vm1158_vm2, %v1761_v3  ;;  %1774 = vtanh.f32 %v1098_v2  ;;  %v1113_v5 = vadd.f32 %v1584_v4, %v2159_v53 }
 0x2a8   :  { %v1763_v6 = vpop.eup %1762  ;;  %v1107_v7 = vpop.f32.mrf.mxu0 }
 0x2a9   :  { %1179 = vst.msk [vmem:[%s2328_s7 + $0xa0] sm:$0xff] %vm1158_vm2, %v1763_v6  ;;  %1776 = vtanh.f32 %v1113_v5  ;;  %v1108_v8 = vadd.f32 %v2159_v53, %v1107_v7 }
 0x2aa   :  { %v1765_v9 = vpop.eup %1764  ;;  %v1587_v10 = vpop.f32.mrf.mxu0 }
 0x2ab   :  { %1182 = vst.msk [vmem:[%s2328_s7 + $0xb8] sm:$0xff] %vm1158_vm2, %v1765_v9  ;;  %1778 = vtanh.f32 %v1108_v8  ;;  %v1123_v11 = vadd.f32 %v1587_v10, %v2159_v53 }
 0x2ac   :  { %v1767_v12 = vpop.eup %1766  ;;  %v1117_v13 = vpop.f32.mrf.mxu0 }
 0x2ad   :  { %1181 = vst.msk [vmem:[%s2328_s7 + $0xb0] sm:$0xff] %vm1158_vm2, %v1767_v12  ;;  %1780 = vtanh.f32 %v1123_v11  ;;  %v1118_v46 = vadd.f32 %v2159_v53, %v1117_v13 }
 0x2ae   :  { %v1769_v14 = vpop.eup %1768 }
 0x2af   :  { %1184 = vst.msk [vmem:[%s2328_s7 + $0xc8] sm:$0xff] %vm1158_vm2, %v1769_v14  ;;  %1782 = vtanh.f32 %v1118_v46 }
 0x2b0   :  { %v1771_v15 = vpop.eup %1770 }
 0x2b1   :  { %1183 = vst.msk [vmem:[%s2328_s7 + $0xc0] sm:$0xff] %vm1158_vm2, %v1771_v15 }
 0x2b2   :  { %v1773_v16 = vpop.eup %1772 }
 0x2b3   :  { %1186 = vst.msk [vmem:[%s2328_s7 + $0xd8] sm:$0xff] %vm1158_vm2, %v1773_v16 }
 0x2b4   :  { %v1775_v53 = vpop.eup %1774 }
 0x2b5   :  { %1185 = vst.msk [vmem:[%s2328_s7 + $0xd0] sm:$0xff] %vm1158_vm2, %v1775_v53 }
 0x2b6   :  { %v1777_v17 = vpop.eup %1776 }
 0x2b7   :  { %1188 = vst.msk [vmem:[%s2328_s7 + $0xe8] sm:$0xff] %vm1158_vm2, %v1777_v17 }
 0x2b8   :  { %v1779_v18 = vpop.eup %1778 }
 0x2b9   :  { %1187 = vst.msk [vmem:[%s2328_s7 + $0xe0] sm:$0xff] %vm1158_vm2, %v1779_v18 }
 0x2ba   :  { %v1781_v20 = vpop.eup %1780 }
 0x2bb   :  { %1190 = vst.msk [vmem:[%s2328_s7 + $0xf8] sm:$0xff] %vm1158_vm2, %v1781_v20 }
 0x2bc   :  { %v1783_v21 = vpop.eup %1782 }
 0x2bd   :  { %1189 = vst.msk [vmem:[%s2328_s7 + $0xf0] sm:$0xff] %vm1158_vm2, %v1783_v21 }

</bundles_post_ra>
